<compile_context>
chip_gen: v6e
topology: v6e:2x2x1
jax: 0.10.0
libtpu: 0.0.40
codegen_flags: <defaults>
</compile_context>

<pallas_src>
import functools

import jax
import jax.numpy as jnp
from jax.experimental import pallas as pl
from jax.experimental.pallas import tpu as pltpu

LANE = 128


def _gcn_aggregate_kernel(a_ref, m_ref, b_ref, out_ref, *, apply_relu,
                          m_resident, tk):
    """One grid step of Out[i-tile] += Â[i-tile, k-tile] @ M[k-tile, :].

    a_ref  : [tm, tk]        bf16 tile of the normalized adjacency Â (streamed)
    m_ref  : [N, P] / [tk,P] bf16 projected features; fully VMEM-resident when
                             m_resident (sliced in-kernel), else a streamed tile
    b_ref  : [1,  P]         f32 bias (lane-padded)
    out_ref: [tm, P]         f32 output tile; same block across the reduction
                             axis, so it doubles as the accumulator (no scratch)
    """
    k = pl.program_id(1)

    @pl.when(k == 0)
    def _():
        out_ref[...] = jnp.zeros_like(out_ref)

    if m_resident:
        start = pl.multiple_of(k * tk, tk)
        m_tile = m_ref[pl.ds(start, tk), :]
    else:
        m_tile = m_ref[...]

    out_ref[...] += jnp.dot(a_ref[...], m_tile,
                            preferred_element_type=jnp.float32)

    @pl.when(k == pl.num_programs(1) - 1)
    def _():
        r = out_ref[...] + b_ref[...]
        if apply_relu:
            r = jnp.maximum(r, 0.0)
        out_ref[...] = r


def _vmem_budget_bytes():
    """Per-generation VMEM budget: 75% of physical, conservative 64 MiB fallback."""
    cap = 64 * 1024 * 1024          # v7x per-TC VMEM (smallest in the fleet)
    try:
        info = pltpu.get_tpu_info()
        c = getattr(info, "vmem_capacity_bytes", None)
        if c:
            cap = int(c)
    except Exception:
        pass
    return (3 * cap) // 4


def _choose_tile(n, preferred):
    for t in preferred:
        if n % t == 0:
            return t
    return LANE  # caller always pads N to a multiple of 128


def gcn_aggregate(a_bf16, m, b, *, apply_relu, tm=None, tk=None):
    """Out = [ReLU](Â @ M + b); Â streamed tile-by-tile, M VMEM-resident if it fits."""
    n = a_bf16.shape[0]
    p = m.shape[1]
    tm = tm or _choose_tile(n, (1024, 512, 256, 128))
    tk = tk or _choose_tile(n, (2048, 1024, 512, 256, 128))
    assert n % tm == 0 and n % tk == 0, "caller must pad N to a tile multiple"

    m_bf16 = m.astype(jnp.bfloat16)
    b_f32 = b.astype(jnp.float32)

    budget = _vmem_budget_bytes()
    # Â tiles double-buffered bf16 + bias + resident f32 output block (2x safety).
    fixed = 2 * tm * tk * 2 + 2 * p * 4 + 2 * tm * p * 4
    resident_need = fixed + 2 * n * p * 2            # whole M slab (2x safety)
    m_resident = resident_need <= budget

    if m_resident:
        m_spec = pl.BlockSpec((n, p), lambda i, k: (0, 0))    # fetched once
        vmem_need = resident_need
        m_bytes = n * p * 2
    else:
        m_spec = pl.BlockSpec((tk, p), lambda i, k: (k, 0))   # streamed per row tile
        vmem_need = fixed + 2 * tk * p * 2
        m_bytes = (n // tm) * n * p * 2

    vmem_limit = min(max(int(vmem_need * 1.5), 32 * 1024 * 1024), budget)

    kernel = functools.partial(_gcn_aggregate_kernel, apply_relu=apply_relu,
                               m_resident=m_resident, tk=tk)

    return pl.pallas_call(
        kernel,
        out_shape=jax.ShapeDtypeStruct((n, p), jnp.float32),
        grid_spec=pltpu.PrefetchScalarGridSpec(
            num_scalar_prefetch=0,
            grid=(n // tm, n // tk),
            # TODO(synk): for real (sparse) graphs, scalar-prefetch a per-row-tile
            # list of nonzero Â column tiles and pl.when-skip all-zero blocks.
            in_specs=[
                pl.BlockSpec((tm, tk), lambda i, k: (i, k)),   # Â tile (streamed)
                m_spec,                                        # projected features
                pl.BlockSpec((1, p), lambda i, k: (0, 0)),     # bias
            ],
            out_specs=pl.BlockSpec((tm, p), lambda i, k: (i, 0)),
        ),
        # TODO(synk): on v7x use CORE_PARALLEL on the row axis (2 TCs) and consider
        # fp8-e4m3 Â; on v6e an int8 Â with a folded scale is the analogous byte win.
        compiler_params=pltpu.CompilerParams(
            dimension_semantics=("parallel", "arbitrary"),
            vmem_limit_bytes=vmem_limit,
        ),
        cost_estimate=pl.CostEstimate(
            flops=2 * n * n * p,
            transcendentals=0,
            bytes_accessed=n * n * 2 + m_bytes + n * p * 4 + p * 4,
        ),
    )(a_bf16, m_bf16, b_f32)


def _pad_cols(x, p):
    c = x.shape[-1]
    return x if c == p else jnp.pad(x, ((0, 0), (0, p - c)))


def _pad_rows(x, n_pad):
    n = x.shape[0]
    return x if n == n_pad else jnp.pad(x, ((0, n_pad - n), (0, 0)))


def _project_layer1(x, w1, p):
    # Tiny [N, F] @ [F, H] projection; lane-padded to width p (glue JAX, negligible
    # next to the O(N^2 * p) aggregation done in the Pallas kernel).
    return _pad_cols(jnp.dot(x, w1, preferred_element_type=jnp.float32), p)


def _project_layer2(h1_pad, w2, h, p):
    # H1_pad has zeros in columns >= H, so the zero-padded W2 gives exactly the
    # lane-padded H1 @ W2.
    w2_pad = jnp.zeros((p, p), jnp.float32).at[:h, :w2.shape[1]].set(w2)
    return jnp.dot(h1_pad, w2_pad, preferred_element_type=jnp.float32)


def gcn_forward(a_norm, x, w1, b1, w2, b2, *, tm=None, tk=None):
    """Two-layer GCN forward; the O(N^2 * P) aggregations run as Pallas kernels.

    a_norm: [N, N] normalized adjacency; pass it already in bf16 so the dominant
    f32->bf16 cast happens once per graph, not once per forward.
    """
    n = a_norm.shape[0]
    h = w1.shape[1]
    c = w2.shape[1]
    p = LANE * pl.cdiv(max(h, c), LANE)     # lane-dense padded feature width

    # Pad N to a tile multiple so the tiled/pipelined path applies to any size.
    if tm is not None or tk is not None:
        align = max(tm or LANE, tk or LANE)
    else:
        align = 512 if n >= 2048 else LANE
    n_pad = align * pl.cdiv(n, align)

    a_bf16 = _pad_rows(_pad_cols(a_norm, n_pad), n_pad).astype(jnp.bfloat16)
    x_pad = _pad_rows(x, n_pad)

    # Layer 1: H1 = ReLU(Â @ (X @ W1) + b1)
    m1 = _project_layer1(x_pad, w1, p)
    h1_pad = gcn_aggregate(a_bf16, m1, _pad_cols(b1, p),
                           apply_relu=True, tm=tm, tk=tk)

    # Layer 2: Out = Â @ (H1 @ W2) + b2
    m2 = _project_layer2(h1_pad, w2, h, p)
    out_pad = gcn_aggregate(a_bf16, m2, _pad_cols(b2, p),
                            apply_relu=False, tm=tm, tk=tk)
    return out_pad[:n, :c]


def gcn_reference(a_norm, x, w1, b1, w2, b2):
    """Plain-JAX reference mirroring the kernel's bf16 rounding of Â and M."""
    h = w1.shape[1]
    c = w2.shape[1]
    p = LANE * pl.cdiv(max(h, c), LANE)
    a32 = a_norm.astype(jnp.bfloat16).astype(jnp.float32)

    def agg(m, b, relu):
        m32 = m.astype(jnp.bfloat16).astype(jnp.float32)
        r = jnp.dot(a32, m32, precision=jax.lax.Precision.HIGHEST) + b
        return jnp.maximum(r, 0.0) if relu else r

    h1 = agg(_project_layer1(x, w1, p), _pad_cols(b1, p), True)
    out = agg(_project_layer2(h1, w2, h, p), _pad_cols(b2, p), False)
    return out[:, :c]


def build_normalized_adjacency(edge_index, num_nodes):
    """Dense Â = D^{-1/2} (A + I) D^{-1/2}, matching PyG gcn_norm.

    edge_index: int32 [2, E]; Â[i, j] weights the message from node j into node i
    (source_to_target flow). Self-loops are added only where missing
    (add_remaining_self_loops); duplicate edges accumulate like PyG message passing.
    """
    src, dst = edge_index[0], edge_index[1]
    a = jnp.zeros((num_nodes, num_nodes), dtype=jnp.float32)
    a = a.at[dst, src].add(1.0)                       # incoming-edge adjacency
    diag = jnp.diagonal(a)
    a = a + jnp.diag(jnp.where(diag == 0, 1.0, 0.0))  # add remaining self-loops
    deg = jnp.sum(a, axis=1)
    deg_inv_sqrt = jnp.where(deg > 0, 1.0 / jnp.sqrt(deg), 0.0)
    return deg_inv_sqrt[:, None] * a * deg_inv_sqrt[None, :]


def glorot(key, shape):
    fan_in, fan_out = shape
    limit = jnp.sqrt(6.0 / (fan_in + fan_out))
    return jax.random.uniform(key, shape, jnp.float32, -limit, limit)


if __name__ == "__main__":
    # Small, deterministic synthetic problem (stands in for the u.data edges).
    num_nodes = 300          # NOT a multiple of 128 -> exercises the padding path
    num_features = 8
    hidden_channels = 32
    num_classes = 4
    num_edges = 1024

    key = jax.random.PRNGKey(0)
    k_x, k_src, k_dst, k_w1, k_w2 = jax.random.split(key, 5)

    # Node features [N, F]
    x = jax.random.normal(k_x, (num_nodes, num_features), dtype=jnp.float32)

    # Synthetic edge_index [2, E] (stands in for the user/movie edges).
    src = jax.random.randint(k_src, (num_edges,), 0, num_nodes, dtype=jnp.int32)
    dst = jax.random.randint(k_dst, (num_edges,), 0, num_nodes, dtype=jnp.int32)
    edge_index = jnp.stack([src, dst], axis=0)

    # GCNConv parameters (deterministic glorot init, zero bias like PyG defaults).
    w1 = glorot(k_w1, (num_features, hidden_channels))
    b1 = jnp.zeros((1, hidden_channels), dtype=jnp.float32)
    w2 = glorot(k_w2, (hidden_channels, num_classes))
    b2 = jnp.zeros((1, num_classes), dtype=jnp.float32)

    # Glue: dense normalized adjacency, cast to bf16 ONCE outside the forward.
    a_norm = build_normalized_adjacency(edge_index, num_nodes)
    a_bf16 = a_norm.astype(jnp.bfloat16)

    # tm=tk=128 -> padded N=384 -> 3x3 grid with a real reduction, resident M,
    # and in-place accumulation into the output block.
    out = gcn_forward(a_bf16, x, w1, b1, w2, b2, tm=128, tk=128)
    out = jax.block_until_ready(out)

    # Reference check (same bf16 rounding of Â / projected slabs, f32 math).
    ref = gcn_reference(a_norm, x, w1, b1, w2, b2)
    assert out.shape == (num_nodes, num_classes)
    assert jnp.allclose(out, ref, atol=5e-3, rtol=5e-3), (
        "Pallas output mismatch vs JAX reference, max abs err = "
        f"{jnp.max(jnp.abs(out - ref))}")

    print("KERNEL_OK")
</pallas_src>

<mosaic_0001>
module attributes {stable_mosaic.version = 11 : i64} {
  func.func @_gcn_aggregate_kernel(%arg0: i32, %arg1: i32, %arg2: memref<128x128xbf16, #tpu.memory_space<vmem>>, %arg3: memref<384x128xbf16, #tpu.memory_space<vmem>>, %arg4: memref<1x128xf32, #tpu.memory_space<vmem>>, %arg5: memref<128x128xf32, #tpu.memory_space<vmem>>) attributes {dimension_semantics = [#tpu.dimension_semantics<parallel>, #tpu.dimension_semantics<arbitrary>], iteration_bounds = array<i64: 3, 3>, scalar_prefetch = 0 : i64, scratch_operands = 0 : i64, tpu.core_type = #tpu.core_type<tc>, window_params = [{transform_indices = @transform_0, window_bounds = array<i64: 128, 128>}, {pipeline_mode = #tpu.pipeline_mode<synchronous>, transform_indices = @transform_1, window_bounds = array<i64: 384, 128>}, {pipeline_mode = #tpu.pipeline_mode<synchronous>, transform_indices = @transform_2, window_bounds = array<i64: 1, 128>}, {transform_indices = @transform_3, window_bounds = array<i64: 128, 128>}]} {
    %c0_i32 = arith.constant 0 : i32
    %0 = arith.cmpi eq, %arg1, %c0_i32 : i32
    %1 = arith.extui %0 : i1 to i32
    %c0_i32_0 = arith.constant 0 : i32
    %2 = arith.cmpi ne, %1, %c0_i32_0 : i32
    scf.if %2 {
      %cst_8 = arith.constant 0.000000e+00 : f32
      %15 = vector.broadcast %cst_8 : f32 to vector<128x128xf32>
      %c0_9 = arith.constant 0 : index
      %c0_10 = arith.constant 0 : index
      %16 = vector.load %arg5[%c0_9, %c0_10] : memref<128x128xf32, #tpu.memory_space<vmem>>, vector<128x128xf32>
      tpu.vector_store %arg5[%c0_9, %c0_10], %15 {strides = array<i32>} : memref<128x128xf32, #tpu.memory_space<vmem>>, vector<128x128xf32>,
    } else {
    }
    %c128_i32 = arith.constant 128 : i32
    %3 = arith.muli %arg1, %c128_i32 : i32
    %4 = tpu.assume_multiple %3, 128 : i32
    %5 = arith.index_cast %4 : i32 to index
    %c0 = arith.constant 0 : index
    %6 = vector.load %arg3[%5, %c0] : memref<384x128xbf16, #tpu.memory_space<vmem>>, vector<128x128xbf16>
    %c0_1 = arith.constant 0 : index
    %c0_2 = arith.constant 0 : index
    %7 = vector.load %arg5[%c0_1, %c0_2] : memref<128x128xf32, #tpu.memory_space<vmem>>, vector<128x128xf32>
    %c0_3 = arith.constant 0 : index
    %c0_4 = arith.constant 0 : index
    %8 = vector.load %arg2[%c0_3, %c0_4] : memref<128x128xbf16, #tpu.memory_space<vmem>>, vector<128x128xbf16>
    %cst = arith.constant dense<0.000000e+00> : vector<128x128xf32>
    %9 = tpu.matmul %8, %6, %cst {dimension_numbers = #tpu.dot_dimension_numbers<[1], [0], [0], [1], [0, 0, 1, 1], [], []>} : vector<128x128xbf16>, vector<128x128xbf16>, vector<128x128xf32> -> vector<128x128xf32>
    %10 = arith.addf %7, %9 : vector<128x128xf32>
    %c0_5 = arith.constant 0 : index
    %c0_6 = arith.constant 0 : index
    %11 = vector.load %arg5[%c0_5, %c0_6] : memref<128x128xf32, #tpu.memory_space<vmem>>, vector<128x128xf32>
    tpu.vector_store %arg5[%c0_5, %c0_6], %10 {strides = array<i32>} : memref<128x128xf32, #tpu.memory_space<vmem>>, vector<128x128xf32>,
    %c2_i32 = arith.constant 2 : i32
    %12 = arith.cmpi eq, %arg1, %c2_i32 : i32
    %13 = arith.extui %12 : i1 to i32
    %c0_i32_7 = arith.constant 0 : i32
    %14 = arith.cmpi ne, %13, %c0_i32_7 : i32
    scf.if %14 {
      %c0_8 = arith.constant 0 : index
      %c0_9 = arith.constant 0 : index
      %15 = vector.load %arg5[%c0_8, %c0_9] : memref<128x128xf32, #tpu.memory_space<vmem>>, vector<128x128xf32>
      %c0_10 = arith.constant 0 : index
      %c0_11 = arith.constant 0 : index
      %16 = vector.load %arg4[%c0_10, %c0_11] : memref<1x128xf32, #tpu.memory_space<vmem>>, vector<1x128xf32>
      %17 = vector.broadcast %16 : vector<1x128xf32> to vector<128x128xf32>
      %18 = arith.addf %15, %17 : vector<128x128xf32>
      %cst_12 = arith.constant 0.000000e+00 : f32
      %19 = vector.broadcast %cst_12 : f32 to vector<128x128xf32>
      %20 = arith.maximumf %18, %19 : vector<128x128xf32>
      %c0_13 = arith.constant 0 : index
      %c0_14 = arith.constant 0 : index
      %21 = vector.load %arg5[%c0_13, %c0_14] : memref<128x128xf32, #tpu.memory_space<vmem>>, vector<128x128xf32>
      tpu.vector_store %arg5[%c0_13, %c0_14], %20 {strides = array<i32>} : memref<128x128xf32, #tpu.memory_space<vmem>>, vector<128x128xf32>,
    } else {
    }
    return
  }
  func.func @transform_0(%arg0: i32, %arg1: i32) -> (i32, i32) {
    %c0_i32 = arith.constant 0 : i32
    return %arg0, %arg1 : i32, i32
  }
  func.func @transform_1(%arg0: i32, %arg1: i32) -> (i32, i32) {
    %c0_i32 = arith.constant 0 : i32
    %c0_i32_0 = arith.constant 0 : i32
    %c0_i32_1 = arith.constant 0 : i32
    return %c0_i32, %c0_i32_0 : i32, i32
  }
  func.func @transform_2(%arg0: i32, %arg1: i32) -> (i32, i32) {
    %c0_i32 = arith.constant 0 : i32
    %c0_i32_0 = arith.constant 0 : i32
    %c0_i32_1 = arith.constant 0 : i32
    return %c0_i32, %c0_i32_0 : i32, i32
  }
  func.func @transform_3(%arg0: i32, %arg1: i32) -> (i32, i32) {
    %c0_i32 = arith.constant 0 : i32
    %c0_i32_0 = arith.constant 0 : i32
    return %arg0, %c0_i32 : i32, i32
  }
}

</mosaic_0001>

<bundles_post_ra>
// kernel: tpu_custom_call.1
= control target key start
LH: loop header
LB: loop body
LE: loop exit
PB: predicated region body
PF: predicated region fallthrough
CT: control target
= control target key end

     0   :  { %s1507_s0 = inlined_call_operand.hbm [shape: bf16[384,384], index: 0, kind: input, shape index: {}]   ;;  %s1508_s1 = inlined_call_operand.hbm [shape: bf16[384,128], index: 1, kind: input, shape index: {}]   ;;  %s1509_s2 = inlined_call_operand.vmem [shape: f32[1,128], index: 2, kind: input, shape index: {}]   ;;  %s1510_s3 = inlined_call_operand.hbm [shape: f32[384,128], index: 3, kind: output, shape index: {}]  }
   0x1   :  { %1523 = sst [smem:[#allocation16_spill]] %s1508_s1 }
   0x2   :  { %1524 = sst [smem:[#allocation17_spill]] %s1510_s3 }
   0x3   :  { %8 = vsyncpa [#allocation3], 0 }
   0x4   :  { %10 = vsyncpa [#allocation3 + $0x1], 0 }
   0x5   :  { %11 = vsyncpa [#allocation6], 0 }
   0x6   :  { %12 = vsyncpa [#allocation4], 0 }
   0x7   :  { %14 = vsyncpa [#allocation4 + $0x1], 0  ;;  %s1157_s12 = smov 0   ;;  %s1159_s13 = smov 0  }
   0x8   :  { %s1161_s14 = smov 0   ;;  %s1163_s15 = smov 0  }
   0x9   :  { %s1165_s16 = smov 0   ;;  %s1167_s17 = smov 0  }
   0xa   :  { %s1169_s18 = smov 0   ;;  %s1171_s19 = smov 0  }
   0xb   :  { %s1173_s20 = smov 0   ;;  %s1175_s21 = smov 0  }
   0xc   :  { %s1177_s22 = smov 0  }
   0xd LB: > { %1525 = sst [smem:[#allocation11_spill]] %s1086_s12  ;;  %s708_s23 = sadd.s32 4294967295, %s1126_s22   ;;  %s1126_s22 = sphi %s1177_s22, %s20_s22   ;;  %s1122_s21 = sphi %s1175_s21, %s1560_s21   ;;  %s1118_s20 = sphi %s1173_s20, %s1552_s20   ;;  %s1114_s19 = sphi %s1171_s19, %s1559_s19   ;;  %s1110_s18 = sphi %s1169_s18, %s1551_s18   ;;  %s1106_s17 = sphi %s1167_s17, %s1558_s17   ;;  %s1102_s16 = sphi %s1165_s16, %s1557_s16   ;;  %s1098_s15 = sphi %s1163_s15, %s1556_s15   ;;  %s1094_s14 = sphi %s1161_s14, %s1555_s14   ;;  %s1090_s13 = sphi %s1159_s13, %s1554_s13   ;;  %s1086_s12 = sphi %s1157_s12, %s1553_s12  }
   0xe   : > { %1526 = sst [smem:[#allocation12_spill]] %s1118_s20  ;;  %s709_s24 = sadd.s32 4294967294, %s1126_s22  }
   0xf   : > { %1527 = sst [smem:[#allocation13_spill]] %s1126_s22  ;;  %p48_p0 = scmp.ne.s32.totalorder %s1106_s17, %s1102_s16 }
  0x10   : > { %p49_p1 = scmp.eq.s32.totalorder %s1126_s22, 0  ;;  %p54_p2 = scmp.ne.s32.totalorder %s1102_s16, %s1098_s15 }
  0x11   : > { %p1217_p3 = scmp.eq.s32.totalorder %s708_s23, 0  ;;  %p119_p5 = scmp.ne.s32.totalorder %s1094_s14, %s1090_s13 }
  0x12   : > { %p1222_p4 = por %p49_p1, %p48_p0  ;;  %p120_p7 = scmp.eq.s32.totalorder %s708_s23, 8 }
  0x13   : > { %p1230_p6 = por %p1217_p3, %p54_p2  ;;  %p125_p8 = scmp.ne.s32.totalorder %s1090_s13, %s1086_s12 }
  0x14   : > { %p126_p9 = scmp.eq.s32.totalorder %s709_s24, 8  ;;  %p1236_p10 = por %p120_p7, %p119_p5 }
  0x15   : > { %s1530_s29 = scalar_select %p1230_p6, 1, 0 }
  0x16   : > { %s1531_s30 = scalar_select %p1236_p10, 1, 0 }
  0x17   : > { %p710_p11 = scmp.ge.s32.totalorder %s1126_s22, 1  ;;  %p1241_p12 = por %p126_p9, %p125_p8 }
  0x18   : > { %p133_p13 = scmp.lt.s32.totalorder %s1126_s22, 10  ;;  %s1128_s6 = smov [#allocation5]  }
  0x19   : > { %s1532_s4 = scalar_select %p1241_p12, 1, 0 }
  0x1a   : > { %p1246_p0 = pnand %p710_p11, %p133_p13  ;;  %s145_s7 = sshll.u32 %s1128_s6, 4  ;;  %s146_s7 = int_to_ptr.vmem [resolvable:$true] %s145_s7 }
  0x1b   : > { %1533 = sst [smem:[#allocation14_spill]] %s1532_s4  ;;  %p834_p2 = scmp.lt.s32.totalorder %s1126_s22, 9 }
  0x1c   : > { %s1534_s5 = scalar_select %p1246_p0, 1, 0 }
  0x1d   : > { %p821_p1 = pneg %p1246_p0  ;;  %p1261_p7 = pnand %p834_p2, %p1222_p4 }
  0x1e   : > { %s959_s10 = scalar_lea.vmem %s146_s7, 3072  ;;  %p967_p12 = scmp.lt.s32.totalorder %s146_s7, %s146_s7 }
  0x1f   : > { %p1255_p5 = pnand %p821_p1, %p1217_p3  ;;  %p960_p9 = scmp.ne.s32.totalorder %s146_s7, %s959_s10 }
  0x20   : > { %p968_p10 = scmp.lt.s32.totalorder %s959_s10, %s959_s10 }
  0x21   : > { %p950_p8 = pneg %p1255_p5 }
  0x22   : > { %p969_p6 = por %p968_p10, %p967_p12 }
  0x23   : > { %p962_p11 = pnand %p960_p9, %p950_p8 }
  0x25   : > { %p963_p13 = pneg %p962_p11 }
  0x27   : > { %p970_p0 = pnand %p969_p6, %p963_p13 }
  0x29   : > { %973 = shalt.err (!%p970_p0)
}
  0x2a   : > { %s1514_s11 = smov 64   ;;  %s1515_s15 = smov 4  }
  0x2b   : > { %s1537_s1 = sld [smem:[#allocation16_spill]]  ;;  %s29_s28 = sadd.s32 1, %s1118_s20 }
  0x2c   : > { %s32_s6 = sadd.s32 1, %s1122_s21  ;;  %p30_p4 = scmp.ge.s32.totalorder %s29_s28, 3 }
  0x2d   : > { %s162_s10 = sand.u32 1, %s1106_s17   ;;  %s812_s27 = smul.u32 48, %s1122_s21 }
  0x2e   : > { %s713_s25 = sshll.u32 %s162_s10, 6  ;;  %s1562_s28 = smov (%p30_p4, %s29_s28), 0 }
  0x2f   : > { %1538 = sst [smem:[#allocation15_spill]] %s1562_s28  ;;  %s1564_s6 = smov (!%p30_p4, %s32_s6), %s1122_s21 }
  0x30   : > { %s37_s8 = ssub.s32 %s1118_s20, %s1562_s28  ;;  %p34_p6 = scmp.ge.s32.totalorder %s1564_s6, 3 }
  0x31   : > { %824 = dma.hbm_to_vmem [thread:$0]  (!%p1255_p5), %s1537_s1, 3072, %s146_s7, [#allocation6], %s1514_s11, %s1514_s11, %s1515_s15  }
  0x32   : > { %s166_s23 = scalar_lea.vmem [#allocation2], %s713_s25  ;;  %s1566_s6 = smov (%p34_p6, %s1564_s6), 0 }
  0x33   : > { %s175_s7 = sshll.u32 %s166_s23, 4  ;;  %s172_s24 = sadd.s32 %s1118_s20, %s812_s27  ;;  %s1287_s7 = int_to_ptr.vmem [resolvable:$true] %s175_s7 }
  0x34   : > { %s36_s11 = ssub.s32 %s1122_s21, %s1566_s6  ;;  %s716_s15 = sshll.u32 %s172_s24, 6 }
  0x35   : > { %s38_s1 = sor.u32 %s37_s8, %s36_s11  ;;  %p107_p10 = scmp.eq.s32.totalorder %s36_s11, 0 }
  0x36   : > { %p39_p12 = scmp.eq.s32.totalorder %s38_s1, 0  ;;  %s174_s12 = scalar_lea.hbm %s1507_s0, %s716_s15 }
  0x37   : > { %s1539_s25 = sadd.s32 1, %s1094_s14  ;;  %s1540_s22 = sadd.s32 1, %s1106_s17 }
  0x38   : > { %s1297_s23 = scalar_select %p107_p10, %s1094_s14, %s1539_s25  }
  0x39   : > { %s1302_s3 = scalar_select %p39_p12, %s1106_s17, %s1540_s22  }
  0x3a   : > { %s163_s27 = scalar_lea.sflag [#allocation3], %s162_s10  ;;  %p976_p0 = pneg %p1261_p7 }
  0x3b   : > { %s987_s20 = scalar_lea.vmem %s1287_s7, 1024  ;;  %s1131_s8 = smov [#allocation2]  }
  0x3c   : > { %p988_p1 = scmp.ne.s32.totalorder %s1287_s7, %s987_s20  ;;  %s992_s11 = sshll.u32 %s1131_s8, 4  ;;  %s993_s11 = int_to_ptr.vmem [resolvable:$false] %s992_s11 }
  0x3d   : > { %s994_s1 = scalar_lea.vmem %s993_s11, 2048  ;;  %p995_p8 = scmp.lt.s32.totalorder %s1287_s7, %s993_s11 }
  0x3e   : > { %p990_p2 = pnand %p988_p1, %p976_p0  ;;  %p996_p9 = scmp.lt.s32.totalorder %s994_s1, %s987_s20 }
  0x40   : > { %p991_p5 = pneg %p990_p2  ;;  %p997_p11 = por %p996_p9, %p995_p8 }
  0x42   : > { %p998_p13 = pnand %p997_p11, %p991_p5 }
  0x44   : > { %1001 = shalt.err (!%p998_p13)
}
  0x45   : > { %s1132_s4 = smov 192   ;;  %s1541_s22 = smov 4  }
  0x46   : > { %s1542_s15 = smov 64   ;;  %p1543_p4 = scmp.ne.s32.totalorder %s1534_s5, 0 }
  0x47   : > { %828 = dma.hbm_to_vmem [thread:$0]  (!%p1261_p7), %s174_s12, 1024, %s1287_s7, %s163_s27, %s1132_s4, %s1542_s15, %s1541_s22  }
  0x48   : > { %187 = sbr.rel (%p1543_p4) target bundleno = 383 (0x17f), region = 32  ;;  %s189_s28 = sand.u32 (!%p1543_p4), 1, %s1102_s16  }
  0x49   : > { %s718_s10 = sshll.u32 (!%p1543_p4), %s189_s28, 6  ;;  %s190_s24 = scalar_lea.sflag (!%p1543_p4), [#allocation3], %s189_s28 }
  0x4a   : > { %s1317_s25 = scalar_lea.vmem (!%p1543_p4), [#allocation2], %s718_s10  ;;  %p1544_p6 = scmp.ne.s32.totalorder (!%p1543_p4), %s1530_s29, 0 }
  0x4d   : > { %1073 = dma.done.wait (%p1544_p6), %s190_s24, 1024  }
  0x4e   : > { %1075 = vsyncadd (%p1544_p6), %s190_s24, 4294966272 }
  0x4f   : > { %1077 = dma.done.wait (%p1217_p3), [#allocation6], 3072  }
  0x50   : > { %1079 = vsyncadd (%p1217_p3), [#allocation6], 4294964224  ;;  %s217_s12 = sand.u32 1, %s1090_s13   ;;  %p721_p7 = scmp.ne.s32.totalorder %s1110_s18, 0 }
  0x51   : > { %s720_s20 = sshll.u32 %s217_s12, 7 }
  0x52   : > { %s1330_s5 = scalar_lea.vmem [#allocation7], %s720_s20  ;;  %226 = sbr.rel (%p721_p7) target bundleno = 96 (0x60), region = 44 }
  0x57   : > { %v1133_v0 = vmov 0.0  }
  0x58   : > { %227 = vst [vmem:[%s1330_s5] sm:$0xff] %v1133_v0  ;;  %228 = vst [vmem:[%s1330_s5 + $0x8] sm:$0xff] %v1133_v0 }
  0x59   : > { %229 = vst [vmem:[%s1330_s5 + $0x10] sm:$0xff] %v1133_v0  ;;  %230 = vst [vmem:[%s1330_s5 + $0x18] sm:$0xff] %v1133_v0 }
  0x5a   : > { %231 = vst [vmem:[%s1330_s5 + $0x20] sm:$0xff] %v1133_v0  ;;  %232 = vst [vmem:[%s1330_s5 + $0x28] sm:$0xff] %v1133_v0 }
  0x5b   : > { %233 = vst [vmem:[%s1330_s5 + $0x30] sm:$0xff] %v1133_v0  ;;  %234 = vst [vmem:[%s1330_s5 + $0x38] sm:$0xff] %v1133_v0 }
  0x5c   : > { %235 = vst [vmem:[%s1330_s5 + $0x40] sm:$0xff] %v1133_v0  ;;  %236 = vst [vmem:[%s1330_s5 + $0x48] sm:$0xff] %v1133_v0 }
  0x5d   : > { %237 = vst [vmem:[%s1330_s5 + $0x50] sm:$0xff] %v1133_v0  ;;  %238 = vst [vmem:[%s1330_s5 + $0x58] sm:$0xff] %v1133_v0 }
  0x5e   : > { %239 = vst [vmem:[%s1330_s5 + $0x60] sm:$0xff] %v1133_v0  ;;  %240 = vst [vmem:[%s1330_s5 + $0x68] sm:$0xff] %v1133_v0 }
  0x5f   : > { %241 = vst [vmem:[%s1330_s5 + $0x70] sm:$0xff] %v1133_v0  ;;  %242 = vst [vmem:[%s1330_s5 + $0x78] sm:$0xff] %v1133_v0 }
  0x60 PF: > { %s722_s26 = sshll.u32 %s1110_s18, 7  ;;  %v940_v1 = vld [vmem:[%s1317_s25] sm:$0xff]   ;;  %v942_v11 = vld [vmem:[%s1317_s25 + $0x8] sm:$0xff]   ;;  %v944_v13 = vld [vmem:[%s1317_s25 + $0x10] sm:$0xff]   ;;  %p740_p3 = scmp.ne.s32.totalorder %s1110_s18, 2 }
  0x61   : > { %s244_s29 = sshra.s32 %s722_s26, 3  ;;  %v941_v2 = vld [vmem:[%s1317_s25 + $0x20] sm:$0xff]   ;;  %780 = vmatprep.mubr.bf16.mxu0 %v940_v1  ;;  %v943_v12 = vld [vmem:[%s1317_s25 + $0x28] sm:$0xff]   ;;  %v945_v14 = vld [vmem:[%s1317_s25 + $0x30] sm:$0xff]  }
  0x62   : > { %s723_s9 = sshll.u32 %s244_s29, 2  ;;  %788 = vmatprep.mubr.bf16.mxu1 %v941_v2  ;;  %v946_v15 = vld [vmem:[%s1317_s25 + $0x18] sm:$0xff]   ;;  %v266_v17 = vld [vmem:[%s1330_s5 + $0x10] sm:$0xff]  ;;  %v264_v21 = vld [vmem:[%s1330_s5] sm:$0xff] }
  0x63   : > { %s1352_s7 = scalar_lea.vmem [#allocation5], %s723_s9  ;;  %v947_v16 = vld [vmem:[%s1317_s25 + $0x38] sm:$0xff]   ;;  %v272_v22 = vld [vmem:[%s1330_s5 + $0x40] sm:$0xff]  ;;  %v265_v33 = vld [vmem:[%s1330_s5 + $0x8] sm:$0xff] }
  0x64   : > { %v932_v3 = vld [vmem:[%s1352_s7 + $0x38] sm:$0xff]   ;;  %v933_v4 = vld [vmem:[%s1352_s7 + $0x30] sm:$0xff]   ;;  %v934_v5 = vld [vmem:[%s1352_s7 + $0x28] sm:$0xff]  }
  0x65   : > { %764 = vmatprep.subr.bf16.mxu0 %v932_v3  ;;  %796 = vmatprep.subr.bf16.mxu1 %v932_v3  ;;  %v935_v6 = vld [vmem:[%s1352_s7 + $0x20] sm:$0xff]   ;;  %v936_v7 = vld [vmem:[%s1352_s7 + $0x18] sm:$0xff]   ;;  %v937_v8 = vld [vmem:[%s1352_s7 + $0x10] sm:$0xff]  }
  0x66   : > { %765 = vmatpush3.bf16.msra.mxu0 %v932_v3  ;;  %804 = vmatpush3.bf16.msra.mxu1 %v932_v3  ;;  %v938_v9 = vld [vmem:[%s1352_s7 + $0x8] sm:$0xff]   ;;  %v939_v10 = vld [vmem:[%s1352_s7] sm:$0xff]   ;;  %v274_v18 = vld [vmem:[%s1330_s5 + $0x50] sm:$0xff] }
  0x67   : > { %766 = vmatprep.subr.bf16.mxu0 %v933_v4  ;;  %797 = vmatprep.subr.bf16.mxu1 %v933_v4  ;;  %v267_v27 = vld [vmem:[%s1330_s5 + $0x18] sm:$0xff]  ;;  %v273_v34 = vld [vmem:[%s1330_s5 + $0x48] sm:$0xff]  ;;  %v270_v39 = vld [vmem:[%s1330_s5 + $0x30] sm:$0xff] }
  0x68   : > { %v275_v28 = vld [vmem:[%s1330_s5 + $0x58] sm:$0xff]  ;;  %v278_v40 = vld [vmem:[%s1330_s5 + $0x70] sm:$0xff]  ;;  %v268_v45 = vld [vmem:[%s1330_s5 + $0x20] sm:$0xff] }
  0x69   : > { %v276_v46 = vld [vmem:[%s1330_s5 + $0x60] sm:$0xff]  ;;  %v271_v51 = vld [vmem:[%s1330_s5 + $0x38] sm:$0xff]  ;;  %v269_v57 = vld [vmem:[%s1330_s5 + $0x28] sm:$0xff] }
  0x6a   : > { %767 = vmatpush3.bf16.msra.mxu0 %v933_v4  ;;  %805 = vmatpush3.bf16.msra.mxu1 %v933_v4  ;;  %v279_v52 = vld [vmem:[%s1330_s5 + $0x78] sm:$0xff]  ;;  %v277_v58 = vld [vmem:[%s1330_s5 + $0x68] sm:$0xff] }
  0x6b   : > { %768 = vmatprep.subr.bf16.mxu0 %v934_v5  ;;  %798 = vmatprep.subr.bf16.mxu1 %v934_v5 }
  0x6e   : > { %769 = vmatpush3.bf16.msra.mxu0 %v934_v5  ;;  %806 = vmatpush3.bf16.msra.mxu1 %v934_v5 }
  0x6f   : > { %770 = vmatprep.subr.bf16.mxu0 %v935_v6  ;;  %799 = vmatprep.subr.bf16.mxu1 %v935_v6 }
  0x72   : > { %771 = vmatpush3.bf16.msra.mxu0 %v935_v6  ;;  %807 = vmatpush3.bf16.msra.mxu1 %v935_v6 }
  0x73   : > { %772 = vmatprep.subr.bf16.mxu0 %v936_v7  ;;  %800 = vmatprep.subr.bf16.mxu1 %v936_v7 }
  0x76   : > { %773 = vmatpush3.bf16.msra.mxu0 %v936_v7  ;;  %808 = vmatpush3.bf16.msra.mxu1 %v936_v7 }
  0x77   : > { %774 = vmatprep.subr.bf16.mxu0 %v937_v8  ;;  %801 = vmatprep.subr.bf16.mxu1 %v937_v8 }
  0x7a   : > { %775 = vmatpush3.bf16.msra.mxu0 %v937_v8  ;;  %809 = vmatpush3.bf16.msra.mxu1 %v937_v8 }
  0x7b   : > { %776 = vmatprep.subr.bf16.mxu0 %v938_v9  ;;  %802 = vmatprep.subr.bf16.mxu1 %v938_v9 }
  0x7e   : > { %777 = vmatpush3.bf16.msra.mxu0 %v938_v9  ;;  %810 = vmatpush3.bf16.msra.mxu1 %v938_v9 }
  0x7f   : > { %778 = vmatprep.subr.bf16.mxu0 %v939_v10  ;;  %803 = vmatprep.subr.bf16.mxu1 %v939_v10 }
  0x82   : > { %779 = vmatpush3.bf16.msra.mxu0 %v939_v10  ;;  %811 = vmatpush3.bf16.msra.mxu1 %v939_v10 }
  0x85   : > { %781 = vmatmul.mubr.bf16.vlgmr.msra.gmra.mxu0 %v942_v11  ;;  %789 = vmatmul.mubr.bf16.vlgmr.msra.gmra.mxu1 %v943_v12 }
  0x86   : > { %784 = vmatprep.mubr.bf16.mxu0 %v944_v13  ;;  %792 = vmatprep.mubr.bf16.mxu1 %v945_v14 }
  0x8d   : > { %785 = vmatmul.mubr.bf16.gmra.mxu0 %v946_v15  ;;  %793 = vmatmul.mubr.bf16.gmra.mxu1 %v947_v16 }
 0x145   : > { %v782_v19 = vpop.f32.mrf.mxu0  ;;  %v790_v20 = vpop.f32.mrf.mxu1 }
 0x146   : > { %v491_v23 = vadd.f32 %v782_v19, %v266_v17  ;;  %v499_v24 = vadd.f32 %v790_v20, %v274_v18 }
 0x147   : > { %v426_v25 = vpop.f32.mrf.mxu0  ;;  %v458_v26 = vpop.f32.mrf.mxu1 }
 0x148   : > { %507 = vst [vmem:[%s1330_s5 + $0x10] sm:$0xff] %v491_v23  ;;  %515 = vst [vmem:[%s1330_s5 + $0x50] sm:$0xff] %v499_v24  ;;  %v489_v29 = vadd.f32 %v426_v25, %v264_v21  ;;  %v497_v30 = vadd.f32 %v458_v26, %v272_v22 }
 0x149   : > { %v783_v31 = vpop.f32.mrf.mxu0  ;;  %v791_v32 = vpop.f32.mrf.mxu1 }
 0x14a   : > { %505 = vst [vmem:[%s1330_s5] sm:$0xff] %v489_v29  ;;  %513 = vst [vmem:[%s1330_s5 + $0x40] sm:$0xff] %v497_v30  ;;  %v492_v35 = vadd.f32 %v783_v31, %v267_v27  ;;  %v500_v36 = vadd.f32 %v791_v32, %v275_v28 }
 0x14b   : > { %v429_v37 = vpop.f32.mrf.mxu0  ;;  %v461_v38 = vpop.f32.mrf.mxu1 }
 0x14c   : > { %508 = vst [vmem:[%s1330_s5 + $0x18] sm:$0xff] %v492_v35  ;;  %516 = vst [vmem:[%s1330_s5 + $0x58] sm:$0xff] %v500_v36  ;;  %v490_v41 = vadd.f32 %v429_v37, %v265_v33  ;;  %v498_v42 = vadd.f32 %v461_v38, %v273_v34 }
 0x14d   : > { %v786_v43 = vpop.f32.mrf.mxu0  ;;  %v794_v44 = vpop.f32.mrf.mxu1 }
 0x14e   : > { %506 = vst [vmem:[%s1330_s5 + $0x8] sm:$0xff] %v490_v41  ;;  %514 = vst [vmem:[%s1330_s5 + $0x48] sm:$0xff] %v498_v42  ;;  %v495_v47 = vadd.f32 %v786_v43, %v270_v39  ;;  %v503_v48 = vadd.f32 %v794_v44, %v278_v40 }
 0x14f   : > { %v442_v49 = vpop.f32.mrf.mxu0  ;;  %v474_v50 = vpop.f32.mrf.mxu1 }
 0x150   : > { %511 = vst [vmem:[%s1330_s5 + $0x30] sm:$0xff] %v495_v47  ;;  %519 = vst [vmem:[%s1330_s5 + $0x70] sm:$0xff] %v503_v48  ;;  %v493_v53 = vadd.f32 %v442_v49, %v268_v45  ;;  %v501_v54 = vadd.f32 %v474_v50, %v276_v46 }
 0x151   : > { %v787_v55 = vpop.f32.mrf.mxu0  ;;  %v795_v56 = vpop.f32.mrf.mxu1 }
 0x152   : > { %509 = vst [vmem:[%s1330_s5 + $0x20] sm:$0xff] %v493_v53  ;;  %517 = vst [vmem:[%s1330_s5 + $0x60] sm:$0xff] %v501_v54  ;;  %v496_v59 = vadd.f32 %v787_v55, %v271_v51  ;;  %v504_v60 = vadd.f32 %v795_v56, %v279_v52  ;;  %524 = sbr.rel (%p740_p3) target bundleno = 357 (0x165), region = 48 }
 0x153   : > { %v445_v61 = vpop.f32.mrf.mxu0  ;;  %v477_v62 = vpop.f32.mrf.mxu1 }
 0x154   : > { %512 = vst [vmem:[%s1330_s5 + $0x38] sm:$0xff] %v496_v59  ;;  %520 = vst [vmem:[%s1330_s5 + $0x78] sm:$0xff] %v504_v60  ;;  %v494_v63 = vadd.f32 %v445_v61, %v269_v57  ;;  %v502_v0 = vadd.f32 %v477_v62, %v277_v58 }
 0x156   : > { %510 = vst [vmem:[%s1330_s5 + $0x28] sm:$0xff] %v494_v63  ;;  %518 = vst [vmem:[%s1330_s5 + $0x68] sm:$0xff] %v502_v0 }
 0x157   : > { %v525_v1 = vld [vmem:[%s1330_s5] sm:$0xff]  ;;  %v526_v3 = vld [vmem:[%s1330_s5 + $0x8] sm:$0xff]  ;;  %v527_v6 = vld [vmem:[%s1330_s5 + $0x10] sm:$0xff] }
 0x158   : > { %v741_v2 = vld [vmem:[%s1509_s2] ss:$0 sm:$0xff]  ;;  %v528_v7 = vld [vmem:[%s1330_s5 + $0x18] sm:$0xff]  ;;  %v531_v13 = vld [vmem:[%s1330_s5 + $0x30] sm:$0xff] }
 0x159   : > { %v548_v4 = vadd.f32 %v741_v2, %v525_v1  ;;  %v549_v5 = vadd.f32 %v741_v2, %v526_v3  ;;  %v529_v8 = vld [vmem:[%s1330_s5 + $0x20] sm:$0xff]  ;;  %v550_v9 = vadd.f32 %v741_v2, %v527_v6  ;;  %v551_v10 = vadd.f32 %v741_v2, %v528_v7  ;;  %v534_v20 = vld [vmem:[%s1330_s5 + $0x48] sm:$0xff]  ;;  %v535_v21 = vld [vmem:[%s1330_s5 + $0x50] sm:$0xff] }
 0x15a   : > { %v552_v11 = vadd.f32 %v741_v2, %v529_v8  ;;  %v554_v18 = vadd.f32 %v741_v2, %v531_v13  ;;  %v533_v19 = vld [vmem:[%s1330_s5 + $0x40] sm:$0xff]  ;;  %v536_v26 = vld [vmem:[%s1330_s5 + $0x58] sm:$0xff]  ;;  %v557_v32 = vadd.f32 %v741_v2, %v534_v20  ;;  %v539_v33 = vld [vmem:[%s1330_s5 + $0x70] sm:$0xff]  ;;  %v558_v36 = vadd.f32 %v741_v2, %v535_v21 }
 0x15b   : > { %v532_v14 = vld [vmem:[%s1330_s5 + $0x38] sm:$0xff]  ;;  %v564_v15 = vmax.f32 %v548_v4, 0.0  ;;  %v565_v16 = vmax.f32 %v549_v5, 0.0  ;;  %v566_v22 = vmax.f32 %v550_v9, 0.0  ;;  %v567_v23 = vmax.f32 %v551_v10, 0.0  ;;  %v537_v27 = vld [vmem:[%s1330_s5 + $0x60] sm:$0xff] }
 0x15c   : > { %v568_v24 = vmax.f32 %v552_v11, 0.0  ;;  %v555_v25 = vadd.f32 %v741_v2, %v532_v14  ;;  %v570_v30 = vmax.f32 %v554_v18, 0.0  ;;  %v556_v31 = vadd.f32 %v741_v2, %v533_v19  ;;  %v540_v34 = vld [vmem:[%s1330_s5 + $0x78] sm:$0xff] }
 0x15d   : > { %v530_v12 = vld [vmem:[%s1330_s5 + $0x28] sm:$0xff]  ;;  %580 = vst [vmem:[%s1330_s5] sm:$0xff] %v564_v15  ;;  %581 = vst [vmem:[%s1330_s5 + $0x8] sm:$0xff] %v565_v16  ;;  %v559_v37 = vadd.f32 %v741_v2, %v536_v26  ;;  %v560_v38 = vadd.f32 %v741_v2, %v537_v27  ;;  %v573_v40 = vmax.f32 %v557_v32, 0.0  ;;  %v562_v42 = vadd.f32 %v741_v2, %v539_v33 }
 0x15e   : > { %v553_v17 = vadd.f32 %v741_v2, %v530_v12  ;;  %v538_v28 = vld [vmem:[%s1330_s5 + $0x68] sm:$0xff]  ;;  %582 = vst [vmem:[%s1330_s5 + $0x10] sm:$0xff] %v566_v22  ;;  %583 = vst [vmem:[%s1330_s5 + $0x18] sm:$0xff] %v567_v23  ;;  %v571_v35 = vmax.f32 %v555_v25, 0.0  ;;  %v572_v39 = vmax.f32 %v556_v31, 0.0  ;;  %v574_v43 = vmax.f32 %v558_v36, 0.0 }
 0x15f   : > { %584 = vst [vmem:[%s1330_s5 + $0x20] sm:$0xff] %v568_v24  ;;  %586 = vst [vmem:[%s1330_s5 + $0x30] sm:$0xff] %v570_v30  ;;  %v561_v41 = vadd.f32 %v741_v2, %v538_v28  ;;  %v575_v44 = vmax.f32 %v559_v37, 0.0  ;;  %v576_v45 = vmax.f32 %v560_v38, 0.0  ;;  %v563_v46 = vadd.f32 %v741_v2, %v540_v34 }
 0x160   : > { %v569_v29 = vmax.f32 %v553_v17, 0.0  ;;  %587 = vst [vmem:[%s1330_s5 + $0x38] sm:$0xff] %v571_v35  ;;  %588 = vst [vmem:[%s1330_s5 + $0x40] sm:$0xff] %v572_v39  ;;  %v578_v48 = vmax.f32 %v562_v42, 0.0 }
 0x161   : > { %589 = vst [vmem:[%s1330_s5 + $0x48] sm:$0xff] %v573_v40  ;;  %v577_v47 = vmax.f32 %v561_v41, 0.0  ;;  %590 = vst [vmem:[%s1330_s5 + $0x50] sm:$0xff] %v574_v43  ;;  %v579_v49 = vmax.f32 %v563_v46, 0.0 }
 0x162   : > { %585 = vst [vmem:[%s1330_s5 + $0x28] sm:$0xff] %v569_v29  ;;  %591 = vst [vmem:[%s1330_s5 + $0x58] sm:$0xff] %v575_v44 }
 0x163   : > { %592 = vst [vmem:[%s1330_s5 + $0x60] sm:$0xff] %v576_v45  ;;  %593 = vst [vmem:[%s1330_s5 + $0x68] sm:$0xff] %v577_v47 }
 0x164   : > { %594 = vst [vmem:[%s1330_s5 + $0x70] sm:$0xff] %v578_v48  ;;  %595 = vst [vmem:[%s1330_s5 + $0x78] sm:$0xff] %v579_v49 }
 0x165 PF: > { %s747_s18 = sshll.u32 %s1114_s19, 11  ;;  %s1545_s4 = sld [smem:[#allocation17_spill]] }
 0x166   : > { %s610_s15 = sshll.u32 %s1330_s5, 4  ;;  %s1447_s28 = scalar_lea.sflag [#allocation4], %s217_s12  ;;  %s1443_s15 = int_to_ptr.vmem [resolvable:$true] %s610_s15 }
 0x167   : > { %s1002_s10 = scalar_lea.vmem %s1443_s15, 2048  ;;  %p1546_p12 = scmp.ne.s32.totalorder %s1531_s30, 0 }
 0x168   : > { %p1003_p10 = scmp.ne.s32.totalorder %s1443_s15, %s1002_s10  ;;  %s1134_s19 = smov [#allocation7]  }
 0x169   : > { %s1006_s24 = sshll.u32 %s1134_s19, 4  ;;  %s1007_s24 = int_to_ptr.vmem [resolvable:$false] %s1006_s24 }
 0x16a   : > { %p1004_p0 = pnand %p1003_p10, %p1546_p12  ;;  %s1008_s25 = scalar_lea.vmem %s1007_s24, 4096 }
 0x16b   : > { %s1440_s22 = scalar_lea.hbm %s1545_s4, %s747_s18  ;;  %p1009_p2 = scmp.lt.s32.totalorder %s1443_s15, %s1007_s24 }
 0x16c   : > { %p1005_p1 = pneg %p1004_p0  ;;  %p1010_p5 = scmp.lt.s32.totalorder %s1008_s25, %s1002_s10 }
 0x16e   : > { %p1011_p8 = por %p1010_p5, %p1009_p2 }
 0x170   : > { %p1012_p9 = pnand %p1011_p8, %p1005_p1 }
 0x172   : > { %1015 = shalt.err (!%p1012_p9)
}
 0x173   : > { %s1016_s12 = scalar_lea.hbm %s1440_s22, 2048  ;;  %s1020_s26 = scalar_lea.hbm %s1545_s4, 6144 }
 0x174   : > { %p1017_p11 = scmp.ne.s32.totalorder %s1440_s22, %s1016_s12  ;;  %p1021_p6 = scmp.lt.s32.totalorder %s1440_s22, %s1545_s4 }
 0x175   : > { %p1022_p7 = scmp.lt.s32.totalorder %s1020_s26, %s1016_s12 }
 0x176   : > { %p1018_p13 = pnand %p1017_p11, %p1546_p12 }
 0x177   : > { %p1023_p3 = por %p1022_p7, %p1021_p6 }
 0x178   : > { %p1019_p4 = pneg %p1018_p13 }
 0x17a   : > { %p1024_p10 = pnand %p1023_p3, %p1019_p4 }
 0x17c   : > { %1027 = shalt.err (!%p1024_p10)
}
 0x17d   : > { %s1135_s7 = smov 128   ;;  %s1136_s27 = smov 8  }
 0x17e   : > { %819 = dma.vmem_to_hbm [thread:$0]  (%p1546_p12), %s1443_s15, 2048, %s1440_s22, %s1447_s28, %s1135_s7, %s1135_s7, %s1136_s27  }
 0x17f PF: > { %s1547_s8 = sld [smem:[#allocation13_spill]] }
 0x180   : > { %s1548_s18 = sld [smem:[#allocation11_spill]] }
 0x181   : > { %s1549_s11 = sld [smem:[#allocation14_spill]] }
 0x185   : > { %p836_p0 = scmp.ge.s32.totalorder %s1547_s8, 2 }
 0x186   : > { %s625_s1 = sand.u32 1, %s1548_s18  }
 0x187   : > { %p1550_p1 = scmp.ne.s32.totalorder %s1549_s11, 0  ;;  %s626_s10 = scalar_lea.sflag [#allocation4], %s625_s1 }
 0x189   : > { %p830_p2 = pnand %p836_p0, %p1550_p1 }
 0x18b   : > { %p831_p5 = pneg %p830_p2 }
 0x18d   : > { %1081 = dma.done.wait (%p831_p5), %s626_s10, 2048  }
 0x18e   : > { %1083 = vsyncadd (%p831_p5), %s626_s10, 4294965248  ;;  %s20_s22 = sadd.s32 1, %s1547_s8   ;;  %s1551_s18 = sld [smem:[#allocation12_spill]] }
 0x18f   : > { %p17_p8 = scmp.ge.s32.totalorder %s20_s22, 11   ;;  %s1552_s20 = sld [smem:[#allocation15_spill]] }
 0x190   : > { %s1553_s12 = smov %s1090_s13  ;;  %s1554_s13 = smov %s1094_s14 }
 0x191   : > { %s1555_s14 = smov %s1297_s23  ;;  %s1556_s15 = smov %s1102_s16 }
 0x192   : > { %s1557_s16 = smov %s1106_s17  ;;  %s1558_s17 = smov %s1302_s3 }
 0x193   : > { %s1559_s19 = smov %s1122_s21  ;;  %s1560_s21 = smov %s1566_s6 }
 0x194   :  { %19 = sbr.rel (!%p17_p8) target bundleno = 13 (0xd), region = 90 }
 0x199   :  { %631 = vsyncpa [#allocation3], 1 }
 0x19a   :  { %633 = vsyncpa [#allocation3 + $0x1], 1 }
 0x19b   :  { %634 = vsyncpa [#allocation6], 1 }
 0x19c   :  { %635 = vsyncpa [#allocation4], 1 }
 0x19d   :  { %637 = vsyncpa [#allocation4 + $0x1], 1 }

</bundles_post_ra>
